<compile_context>
chip_gen: v5e
topology: v5e:2x2
jax: 0.10.0
libtpu: 0.0.40
codegen_flags: <defaults>
</compile_context>

<pallas_src>
import math
from functools import partial

import jax
import jax.numpy as jnp
import numpy as np
from jax import lax
from jax.experimental import pallas as pl
from jax.experimental.pallas import tpu as pltpu


def _round_up(x, m):
    return (x + m - 1) // m * m


# Scoped-VMEM cap.  Defaults (16/32/32 MiB on v5e/v6e/v7x) are what limit tile
# sizes, not physical VMEM; 64 MiB is <= physical on every generation.
_VMEM_LIMIT_BYTES = 64 * 1024 * 1024


def _const_block_spec(shape):
    """Grid-constant block (weights / biases): same block index at every grid point,
    so it is fetched once; single-buffer it to avoid wasting VMEM on a second buffer
    that would never be used (matters at large H on v7x's 64 MiB VMEM)."""
    kw = {}
    if hasattr(pl, "Buffered"):
        kw["pipeline_mode"] = pl.Buffered(1)
    return pl.BlockSpec(shape, lambda b, t: (0,) * len(shape), **kw)


# -----------------------------------------------------------------------------
# Kernel 1: the sequential deep-RNN recurrence. Emits H1 states (T, B, H).
# Grid: (batch blocks [parallel], time chunks [arbitrary]); hidden state carried
# across time chunks in VMEM scratch, reset at the start of each batch block.
# NOTE: the time axis MUST stay the innermost grid dim (sequential carry).
# -----------------------------------------------------------------------------
def drnn_recurrence_kernel(xw0_ref, whh0_ref, bh0_ref, wxh1_ref, whh1_ref, bh1_ref,
                           h1_out_ref, h0_sc, h1_sc, *, t_chunk):
    tc = pl.program_id(1)

    @pl.when(tc == 0)
    def _():
        # state=None in the torch module -> zero-initialized hidden states.
        h0_sc[...] = jnp.zeros_like(h0_sc)
        h1_sc[...] = jnp.zeros_like(h1_sc)

    # Hoist weight/bias loads and the bias broadcasts out of the serial time loop.
    whh0 = whh0_ref[...]
    wxh1 = wxh1_ref[...]
    whh1 = whh1_ref[...]
    bh0 = jnp.broadcast_to(bh0_ref[...], h0_sc.shape)
    bh1 = jnp.broadcast_to(bh1_ref[...], h1_sc.shape)
    mdt = whh0.dtype        # matmul-input dtype (bf16 fast path or f32)
    f32 = jnp.float32

    def step(s, carry):
        h0, h1 = carry                                   # f32 carries
        # Layer-1 recurrent matmul depends only on the PREVIOUS state: issue it
        # first so the MXU overlaps it with the layer-0 dependency chain.
        p1 = jnp.dot(h1.astype(mdt), whh1, preferred_element_type=f32)
        xw0_t = xw0_ref[s].astype(f32)                   # (Bb, Hp) == W_xh0[tok_t]
        h0 = jnp.tanh(
            xw0_t
            + jnp.dot(h0.astype(mdt), whh0, preferred_element_type=f32)
            + bh0)
        h1 = jnp.tanh(
            jnp.dot(h0.astype(mdt), wxh1, preferred_element_type=f32)
            + p1 + bh1)
        h1_out_ref[s] = h1.astype(h1_out_ref.dtype)
        return (h0, h1)

    h0, h1 = lax.fori_loop(0, t_chunk, step, (h0_sc[...], h1_sc[...]), unroll=True)
    h0_sc[...] = h0
    h1_sc[...] = h1


# -----------------------------------------------------------------------------
# Kernel 2: output head Y = H1 @ W_hq + b_q as one large lane-dense matmul.
# Hp is a single K block (no K accumulation) -- fine for Hp <= ~2048.
# -----------------------------------------------------------------------------
def head_kernel(h_ref, w_ref, b_ref, y_ref):
    y_ref[...] = (jnp.dot(h_ref[...], w_ref[...],
                          preferred_element_type=jnp.float32)
                  + b_ref[...])


def rnnlm_forward(X, params, *, t_chunk=8, matmul_dtype=jnp.bfloat16):
    """X: (B, T) int32 tokens -> logits (B, T, V) float32."""
    B, T = X.shape
    V, H = params["W_xh0"].shape

    f32 = jnp.float32
    mdt = matmul_dtype

    # ---- pad to hardware tiles: lane=128, f32 sublane=8 ----------------------
    Hp = _round_up(H, 128)
    Vp = _round_up(V, 128)
    Bp = _round_up(B, 8)
    Tc = t_chunk
    Tp = _round_up(T, Tc)

    pad2 = lambda a, r, c, dt: jnp.pad(
        a.astype(dt), ((0, r - a.shape[0]), (0, c - a.shape[1])))
    pad1 = lambda a, n: jnp.pad(a.astype(f32), (0, n - a.shape[0]))

    w_xh0 = pad2(params["W_xh0"], V, Hp, mdt)      # rows indexed by token
    w_hh0 = pad2(params["W_hh0"], Hp, Hp, mdt)
    w_xh1 = pad2(params["W_xh1"], Hp, Hp, mdt)
    w_hh1 = pad2(params["W_hh1"], Hp, Hp, mdt)
    b_h0 = pad1(params["b_h0"], Hp).reshape(1, Hp)
    b_h1 = pad1(params["b_h1"], Hp).reshape(1, Hp)

    # ---- embedding: one_hot(X.T) @ W_xh0 == W_xh0[X.T] (row gather) ----------
    # Pad the token matrix first, then gather once at the padded shape: avoids an
    # extra full-size (Tp,Bp,Hp) pad copy in HBM.  Padded rows are sliced off later.
    Xt = jnp.pad(X.T.astype(jnp.int32), ((0, Tp - T), (0, Bp - B)))
    xw0 = jnp.take(w_xh0, Xt, axis=0)                            # (Tp, Bp, Hp) mdt

    # ---- batch blocking -------------------------------------------------------
    # Only split the batch when each block still fills the MXU M-dim; on 1-TC
    # parts (v5e/v6e) the grid is a serial loop and splitting just doubles the
    # sequential recurrence time.
    # TODO(synk): on v7x consider pltpu.CORE_PARALLEL on axis 0 for guaranteed
    # 2-TC sharding when nb == 2.
    nb = 2 if (Bp % 2 == 0 and Bp // 2 >= 128) else 1
    Bb = Bp // nb
    nt = Tp // Tc

    h1_states = pl.pallas_call(
        partial(drnn_recurrence_kernel, t_chunk=Tc),
        out_shape=jax.ShapeDtypeStruct((Tp, Bp, Hp), mdt),
        grid_spec=pltpu.PrefetchScalarGridSpec(
            num_scalar_prefetch=0,
            grid=(nb, nt),
            in_specs=[
                pl.BlockSpec((Tc, Bb, Hp), lambda b, t: (t, b, 0)),  # xw0 chunk
                _const_block_spec((Hp, Hp)),    # W_hh0
                _const_block_spec((1, Hp)),     # b_h0
                _const_block_spec((Hp, Hp)),    # W_xh1
                _const_block_spec((Hp, Hp)),    # W_hh1
                _const_block_spec((1, Hp)),     # b_h1
            ],
            out_specs=pl.BlockSpec((Tc, Bb, Hp), lambda b, t: (t, b, 0)),
            scratch_shapes=[
                pltpu.VMEM((Bb, Hp), f32),   # H0 carried across time chunks
                pltpu.VMEM((Bb, Hp), f32),   # H1 carried across time chunks
            ],
        ),
        compiler_params=pltpu.CompilerParams(
            # time axis must stay sequential ("arbitrary"): hidden-state carry.
            dimension_semantics=("parallel", "arbitrary"),
            vmem_limit_bytes=_VMEM_LIMIT_BYTES,
        ),
    )(xw0, w_hh0, b_h0, w_xh1, w_hh1, b_h1)

    # ---- output head: one big lane-dense matmul over all (t, b) rows ---------
    R = Tp * Bp
    tm = min(256, _round_up(R, 8))       # fixed row tile (pad R up to it)
    tv = min(2048, Vp)                   # fixed lane tile (pad Vp up to it)
    Rp = _round_up(R, tm)
    Vp2 = _round_up(Vp, tv)

    w_hq = pad2(params["W_hq"], Hp, Vp2, mdt)
    b_q = pad1(params["b_q"], Vp2).reshape(1, Vp2)

    h2d = h1_states.reshape(R, Hp)
    if Rp != R:
        h2d = jnp.pad(h2d, ((0, Rp - R), (0, 0)))

    n_r, n_v = Rp // tm, Vp2 // tv
    if Hp * Vp2 >= Rp * Hp:
        # W_hq is the larger operand: rows innermost so each W_hq tile stays
        # resident and W_hq streams from HBM exactly once.
        grid = (n_v, n_r)
        h_spec = pl.BlockSpec((tm, Hp), lambda j, i: (i, 0))
        w_spec = pl.BlockSpec((Hp, tv), lambda j, i: (0, j))
        b_spec = pl.BlockSpec((1, tv), lambda j, i: (0, j))
        o_spec = pl.BlockSpec((tm, tv), lambda j, i: (i, j))
    else:
        grid = (n_r, n_v)
        h_spec = pl.BlockSpec((tm, Hp), lambda i, j: (i, 0))
        w_spec = pl.BlockSpec((Hp, tv), lambda i, j: (0, j))
        b_spec = pl.BlockSpec((1, tv), lambda i, j: (0, j))
        o_spec = pl.BlockSpec((tm, tv), lambda i, j: (i, j))

    y2d = pl.pallas_call(
        head_kernel,
        out_shape=jax.ShapeDtypeStruct((Rp, Vp2), f32),
        grid_spec=pltpu.PrefetchScalarGridSpec(
            num_scalar_prefetch=0,
            grid=grid,
            in_specs=[h_spec, w_spec, b_spec],
            out_specs=o_spec,
        ),
        compiler_params=pltpu.CompilerParams(
            dimension_semantics=("parallel", "parallel"),
            vmem_limit_bytes=_VMEM_LIMIT_BYTES,
        ),
    )(h2d, w_hq, b_q)

    # drop padding, then (T, B, V) -> (B, T, V) == torch.stack(outputs, 1)
    y = y2d[:R].reshape(Tp, Bp, Vp2)[:T, :B, :V]
    return jnp.transpose(y, (1, 0, 2))


def rnnlm_reference(X, params):
    """Pure-JAX reference of the same forward pass (for verification)."""
    B, T = X.shape
    H, V = params["W_hq"].shape
    embs = jax.nn.one_hot(X.T, V, dtype=jnp.float32)  # (T, B, V)
    h0 = jnp.zeros((B, H), jnp.float32)
    h1 = jnp.zeros((B, H), jnp.float32)
    outs = []
    for t in range(T):
        x_t = embs[t]
        h0 = jnp.tanh(x_t @ params["W_xh0"] + h0 @ params["W_hh0"] + params["b_h0"])
        h1 = jnp.tanh(h0 @ params["W_xh1"] + h1 @ params["W_hh1"] + params["b_h1"])
        outs.append(h1 @ params["W_hq"] + params["b_q"])
    return jnp.stack(outs, axis=1)  # (B, T, V)


def init_params(key, vocab_size, num_hiddens, sigma=0.01):
    ks = jax.random.split(key, 6)
    V, H = vocab_size, num_hiddens
    return {
        # deep-RNN (2 stacked scratch RNN layers)
        "W_xh0": jax.random.normal(ks[0], (V, H), jnp.float32) * sigma,
        "W_hh0": jax.random.normal(ks[1], (H, H), jnp.float32) * sigma,
        "b_h0": jnp.zeros((H,), jnp.float32),
        "W_xh1": jax.random.normal(ks[2], (H, H), jnp.float32) * sigma,
        "W_hh1": jax.random.normal(ks[3], (H, H), jnp.float32) * sigma,
        "b_h1": jnp.zeros((H,), jnp.float32),
        # RNNLMScratch output head
        "W_hq": jax.random.normal(ks[4], (H, V), jnp.float32) * sigma,
        "b_q": jnp.zeros((V,), jnp.float32),
    }


if __name__ == "__main__":
    vocab_size = 32
    num_hiddens = 32
    batch, seq = 4, 8
    sigma = 0.1

    key = jax.random.PRNGKey(0)
    pkey, xkey = jax.random.split(key)
    params = init_params(pkey, vocab_size, num_hiddens, sigma=sigma)

    X = jax.random.randint(xkey, (batch, seq), 0, vocab_size, dtype=jnp.int32)

    y_ref = rnnlm_reference(X, params)

    # Exact-parity path (f32 matmul inputs).
    y_f32 = jax.block_until_ready(
        rnnlm_forward(X, params, t_chunk=4, matmul_dtype=jnp.float32))
    assert y_f32.shape == (batch, seq, vocab_size)
    np.testing.assert_allclose(np.asarray(y_f32), np.asarray(y_ref),
                               rtol=1e-5, atol=1e-5)

    # Fast path (bf16 MXU inputs, f32 accumulation, bf16 H1 states).
    y_bf16 = jax.block_until_ready(
        rnnlm_forward(X, params, t_chunk=8, matmul_dtype=jnp.bfloat16))
    assert y_bf16.shape == (batch, seq, vocab_size)
    np.testing.assert_allclose(np.asarray(y_bf16), np.asarray(y_ref),
                               rtol=3e-2, atol=1e-3)

    print("KERNEL_OK")
</pallas_src>

<mosaic_0001>
module attributes {stable_mosaic.version = 11 : i64} {
  func.func @drnn_recurrence_kernel(%arg0: i32, %arg1: i32, %arg2: memref<4x8x128xf32, #tpu.memory_space<vmem>>, %arg3: memref<128x128xf32, #tpu.memory_space<vmem>>, %arg4: memref<1x128xf32, #tpu.memory_space<vmem>>, %arg5: memref<128x128xf32, #tpu.memory_space<vmem>>, %arg6: memref<128x128xf32, #tpu.memory_space<vmem>>, %arg7: memref<1x128xf32, #tpu.memory_space<vmem>>, %arg8: memref<4x8x128xf32, #tpu.memory_space<vmem>>, %arg9: memref<8x128xf32, #tpu.memory_space<vmem>>, %arg10: memref<8x128xf32, #tpu.memory_space<vmem>>) attributes {dimension_semantics = [#tpu.dimension_semantics<parallel>, #tpu.dimension_semantics<arbitrary>], iteration_bounds = array<i64: 1, 2>, scalar_prefetch = 0 : i64, scratch_operands = 2 : i64, tpu.core_type = #tpu.core_type<tc>, window_params = [{transform_indices = @transform_0, window_bounds = array<i64: 4, 8, 128>}, {pipeline_mode = #tpu.pipeline_mode<synchronous>, transform_indices = @transform_1, window_bounds = array<i64: 128, 128>}, {pipeline_mode = #tpu.pipeline_mode<synchronous>, transform_indices = @transform_2, window_bounds = array<i64: 1, 128>}, {pipeline_mode = #tpu.pipeline_mode<synchronous>, transform_indices = @transform_3, window_bounds = array<i64: 128, 128>}, {pipeline_mode = #tpu.pipeline_mode<synchronous>, transform_indices = @transform_4, window_bounds = array<i64: 128, 128>}, {pipeline_mode = #tpu.pipeline_mode<synchronous>, transform_indices = @transform_5, window_bounds = array<i64: 1, 128>}, {transform_indices = @transform_6, window_bounds = array<i64: 4, 8, 128>}]} {
    %c0_i32 = arith.constant 0 : i32
    %0 = arith.cmpi eq, %arg1, %c0_i32 : i32
    %1 = arith.extui %0 : i1 to i32
    %c0_i32_0 = arith.constant 0 : i32
    %2 = arith.cmpi ne, %1, %c0_i32_0 : i32
    scf.if %2 {
      %cst_46 = arith.constant 0.000000e+00 : f32
      %80 = vector.broadcast %cst_46 : f32 to vector<8x128xf32>
      %c0_47 = arith.constant 0 : index
      %c0_48 = arith.constant 0 : index
      %81 = vector.load %arg9[%c0_47, %c0_48] : memref<8x128xf32, #tpu.memory_space<vmem>>, vector<8x128xf32>
      tpu.vector_store %arg9[%c0_47, %c0_48], %80 {strides = array<i32>} : memref<8x128xf32, #tpu.memory_space<vmem>>, vector<8x128xf32>,
      %cst_49 = arith.constant 0.000000e+00 : f32
      %82 = vector.broadcast %cst_49 : f32 to vector<8x128xf32>
      %c0_50 = arith.constant 0 : index
      %c0_51 = arith.constant 0 : index
      %83 = vector.load %arg10[%c0_50, %c0_51] : memref<8x128xf32, #tpu.memory_space<vmem>>, vector<8x128xf32>
      tpu.vector_store %arg10[%c0_50, %c0_51], %82 {strides = array<i32>} : memref<8x128xf32, #tpu.memory_space<vmem>>, vector<8x128xf32>,
    } else {
    }
    %c0 = arith.constant 0 : index
    %c0_1 = arith.constant 0 : index
    %3 = vector.load %arg3[%c0, %c0_1] : memref<128x128xf32, #tpu.memory_space<vmem>>, vector<128x128xf32>
    %c0_2 = arith.constant 0 : index
    %c0_3 = arith.constant 0 : index
    %4 = vector.load %arg5[%c0_2, %c0_3] : memref<128x128xf32, #tpu.memory_space<vmem>>, vector<128x128xf32>
    %c0_4 = arith.constant 0 : index
    %c0_5 = arith.constant 0 : index
    %5 = vector.load %arg6[%c0_4, %c0_5] : memref<128x128xf32, #tpu.memory_space<vmem>>, vector<128x128xf32>
    %c0_6 = arith.constant 0 : index
    %c0_7 = arith.constant 0 : index
    %6 = vector.load %arg4[%c0_6, %c0_7] : memref<1x128xf32, #tpu.memory_space<vmem>>, vector<1x128xf32>
    %7 = vector.shape_cast %6 : vector<1x128xf32> to vector<1x128xf32>
    %8 = vector.broadcast %7 : vector<1x128xf32> to vector<8x128xf32>
    %c0_8 = arith.constant 0 : index
    %c0_9 = arith.constant 0 : index
    %9 = vector.load %arg7[%c0_8, %c0_9] : memref<1x128xf32, #tpu.memory_space<vmem>>, vector<1x128xf32>
    %10 = vector.shape_cast %9 : vector<1x128xf32> to vector<1x128xf32>
    %11 = vector.broadcast %10 : vector<1x128xf32> to vector<8x128xf32>
    %c0_10 = arith.constant 0 : index
    %c0_11 = arith.constant 0 : index
    %12 = vector.load %arg9[%c0_10, %c0_11] : memref<8x128xf32, #tpu.memory_space<vmem>>, vector<8x128xf32>
    %c0_12 = arith.constant 0 : index
    %c0_13 = arith.constant 0 : index
    %13 = vector.load %arg10[%c0_12, %c0_13] : memref<8x128xf32, #tpu.memory_space<vmem>>, vector<8x128xf32>
    %c0_i32_14 = arith.constant 0 : i32
    %cst = arith.constant dense<0.000000e+00> : vector<8x128xf32>
    %14 = tpu.matmul %13, %5, %cst {dimension_numbers = #tpu.dot_dimension_numbers<[1], [0], [0], [1], [0, 0, 1, 1], [], []>} : vector<8x128xf32>, vector<128x128xf32>, vector<8x128xf32> -> vector<8x128xf32>
    %15 = arith.index_cast %c0_i32_14 : i32 to index
    %c0_15 = arith.constant 0 : index
    %c0_16 = arith.constant 0 : index
    %16 = vector.load %arg2[%15, %c0_15, %c0_16] : memref<4x8x128xf32, #tpu.memory_space<vmem>>, vector<1x8x128xf32>
    %17 = vector.shape_cast %16 : vector<1x8x128xf32> to vector<8x128xf32>
    %cst_17 = arith.constant dense<0.000000e+00> : vector<8x128xf32>
    %18 = tpu.matmul %12, %3, %cst_17 {dimension_numbers = #tpu.dot_dimension_numbers<[1], [0], [0], [1], [0, 0, 1, 1], [], []>} : vector<8x128xf32>, vector<128x128xf32>, vector<8x128xf32> -> vector<8x128xf32>
    %19 = arith.addf %17, %18 : vector<8x128xf32>
    %20 = arith.addf %19, %8 : vector<8x128xf32>
    %21 = math.tanh %20 : vector<8x128xf32>
    %cst_18 = arith.constant dense<0.000000e+00> : vector<8x128xf32>
    %22 = tpu.matmul %21, %4, %cst_18 {dimension_numbers = #tpu.dot_dimension_numbers<[1], [0], [0], [1], [0, 0, 1, 1], [], []>} : vector<8x128xf32>, vector<128x128xf32>, vector<8x128xf32> -> vector<8x128xf32>
    %23 = arith.addf %22, %14 : vector<8x128xf32>
    %24 = arith.addf %23, %11 : vector<8x128xf32>
    %25 = math.tanh %24 : vector<8x128xf32>
    %26 = arith.index_cast %c0_i32_14 : i32 to index
    %c0_19 = arith.constant 0 : index
    %c0_20 = arith.constant 0 : index
    %27 = vector.load %arg8[%26, %c0_19, %c0_20] : memref<4x8x128xf32, #tpu.memory_space<vmem>>, vector<1x8x128xf32>
    %28 = vector.shape_cast %27 : vector<1x8x128xf32> to vector<8x128xf32>
    %29 = vector.shape_cast %25 : vector<8x128xf32> to vector<1x8x128xf32>
    tpu.vector_store %arg8[%26, %c0_19, %c0_20], %29 {strides = array<i32>} : memref<4x8x128xf32, #tpu.memory_space<vmem>>, vector<1x8x128xf32>,
    %c1_i32 = arith.constant 1 : i32
    %cst_21 = arith.constant dense<0.000000e+00> : vector<8x128xf32>
    %30 = tpu.matmul %25, %5, %cst_21 {dimension_numbers = #tpu.dot_dimension_numbers<[1], [0], [0], [1], [0, 0, 1, 1], [], []>} : vector<8x128xf32>, vector<128x128xf32>, vector<8x128xf32> -> vector<8x128xf32>
    %31 = arith.index_cast %c1_i32 : i32 to index
    %c0_22 = arith.constant 0 : index
    %c0_23 = arith.constant 0 : index
    %32 = vector.load %arg2[%31, %c0_22, %c0_23] : memref<4x8x128xf32, #tpu.memory_space<vmem>>, vector<1x8x128xf32>
    %33 = vector.shape_cast %32 : vector<1x8x128xf32> to vector<8x128xf32>
    %cst_24 = arith.constant dense<0.000000e+00> : vector<8x128xf32>
    %34 = tpu.matmul %21, %3, %cst_24 {dimension_numbers = #tpu.dot_dimension_numbers<[1], [0], [0], [1], [0, 0, 1, 1], [], []>} : vector<8x128xf32>, vector<128x128xf32>, vector<8x128xf32> -> vector<8x128xf32>
    %35 = arith.addf %33, %34 : vector<8x128xf32>
    %36 = arith.addf %35, %8 : vector<8x128xf32>
    %37 = math.tanh %36 : vector<8x128xf32>
    %cst_25 = arith.constant dense<0.000000e+00> : vector<8x128xf32>
    %38 = tpu.matmul %37, %4, %cst_25 {dimension_numbers = #tpu.dot_dimension_numbers<[1], [0], [0], [1], [0, 0, 1, 1], [], []>} : vector<8x128xf32>, vector<128x128xf32>, vector<8x128xf32> -> vector<8x128xf32>
    %39 = arith.addf %38, %30 : vector<8x128xf32>
    %40 = arith.addf %39, %11 : vector<8x128xf32>
    %41 = math.tanh %40 : vector<8x128xf32>
    %42 = arith.index_cast %c1_i32 : i32 to index
    %c0_26 = arith.constant 0 : index
    %c0_27 = arith.constant 0 : index
    %43 = vector.load %arg8[%42, %c0_26, %c0_27] : memref<4x8x128xf32, #tpu.memory_space<vmem>>, vector<1x8x128xf32>
    %44 = vector.shape_cast %43 : vector<1x8x128xf32> to vector<8x128xf32>
    %45 = vector.shape_cast %41 : vector<8x128xf32> to vector<1x8x128xf32>
    tpu.vector_store %arg8[%42, %c0_26, %c0_27], %45 {strides = array<i32>} : memref<4x8x128xf32, #tpu.memory_space<vmem>>, vector<1x8x128xf32>,
    %c2_i32 = arith.constant 2 : i32
    %cst_28 = arith.constant dense<0.000000e+00> : vector<8x128xf32>
    %46 = tpu.matmul %41, %5, %cst_28 {dimension_numbers = #tpu.dot_dimension_numbers<[1], [0], [0], [1], [0, 0, 1, 1], [], []>} : vector<8x128xf32>, vector<128x128xf32>, vector<8x128xf32> -> vector<8x128xf32>
    %47 = arith.index_cast %c2_i32 : i32 to index
    %c0_29 = arith.constant 0 : index
    %c0_30 = arith.constant 0 : index
    %48 = vector.load %arg2[%47, %c0_29, %c0_30] : memref<4x8x128xf32, #tpu.memory_space<vmem>>, vector<1x8x128xf32>
    %49 = vector.shape_cast %48 : vector<1x8x128xf32> to vector<8x128xf32>
    %cst_31 = arith.constant dense<0.000000e+00> : vector<8x128xf32>
    %50 = tpu.matmul %37, %3, %cst_31 {dimension_numbers = #tpu.dot_dimension_numbers<[1], [0], [0], [1], [0, 0, 1, 1], [], []>} : vector<8x128xf32>, vector<128x128xf32>, vector<8x128xf32> -> vector<8x128xf32>
    %51 = arith.addf %49, %50 : vector<8x128xf32>
    %52 = arith.addf %51, %8 : vector<8x128xf32>
    %53 = math.tanh %52 : vector<8x128xf32>
    %cst_32 = arith.constant dense<0.000000e+00> : vector<8x128xf32>
    %54 = tpu.matmul %53, %4, %cst_32 {dimension_numbers = #tpu.dot_dimension_numbers<[1], [0], [0], [1], [0, 0, 1, 1], [], []>} : vector<8x128xf32>, vector<128x128xf32>, vector<8x128xf32> -> vector<8x128xf32>
    %55 = arith.addf %54, %46 : vector<8x128xf32>
    %56 = arith.addf %55, %11 : vector<8x128xf32>
    %57 = math.tanh %56 : vector<8x128xf32>
    %58 = arith.index_cast %c2_i32 : i32 to index
    %c0_33 = arith.constant 0 : index
    %c0_34 = arith.constant 0 : index
    %59 = vector.load %arg8[%58, %c0_33, %c0_34] : memref<4x8x128xf32, #tpu.memory_space<vmem>>, vector<1x8x128xf32>
    %60 = vector.shape_cast %59 : vector<1x8x128xf32> to vector<8x128xf32>
    %61 = vector.shape_cast %57 : vector<8x128xf32> to vector<1x8x128xf32>
    tpu.vector_store %arg8[%58, %c0_33, %c0_34], %61 {strides = array<i32>} : memref<4x8x128xf32, #tpu.memory_space<vmem>>, vector<1x8x128xf32>,
    %c3_i32 = arith.constant 3 : i32
    %cst_35 = arith.constant dense<0.000000e+00> : vector<8x128xf32>
    %62 = tpu.matmul %57, %5, %cst_35 {dimension_numbers = #tpu.dot_dimension_numbers<[1], [0], [0], [1], [0, 0, 1, 1], [], []>} : vector<8x128xf32>, vector<128x128xf32>, vector<8x128xf32> -> vector<8x128xf32>
    %63 = arith.index_cast %c3_i32 : i32 to index
    %c0_36 = arith.constant 0 : index
    %c0_37 = arith.constant 0 : index
    %64 = vector.load %arg2[%63, %c0_36, %c0_37] : memref<4x8x128xf32, #tpu.memory_space<vmem>>, vector<1x8x128xf32>
    %65 = vector.shape_cast %64 : vector<1x8x128xf32> to vector<8x128xf32>
    %cst_38 = arith.constant dense<0.000000e+00> : vector<8x128xf32>
    %66 = tpu.matmul %53, %3, %cst_38 {dimension_numbers = #tpu.dot_dimension_numbers<[1], [0], [0], [1], [0, 0, 1, 1], [], []>} : vector<8x128xf32>, vector<128x128xf32>, vector<8x128xf32> -> vector<8x128xf32>
    %67 = arith.addf %65, %66 : vector<8x128xf32>
    %68 = arith.addf %67, %8 : vector<8x128xf32>
    %69 = math.tanh %68 : vector<8x128xf32>
    %cst_39 = arith.constant dense<0.000000e+00> : vector<8x128xf32>
    %70 = tpu.matmul %69, %4, %cst_39 {dimension_numbers = #tpu.dot_dimension_numbers<[1], [0], [0], [1], [0, 0, 1, 1], [], []>} : vector<8x128xf32>, vector<128x128xf32>, vector<8x128xf32> -> vector<8x128xf32>
    %71 = arith.addf %70, %62 : vector<8x128xf32>
    %72 = arith.addf %71, %11 : vector<8x128xf32>
    %73 = math.tanh %72 : vector<8x128xf32>
    %74 = arith.index_cast %c3_i32 : i32 to index
    %c0_40 = arith.constant 0 : index
    %c0_41 = arith.constant 0 : index
    %75 = vector.load %arg8[%74, %c0_40, %c0_41] : memref<4x8x128xf32, #tpu.memory_space<vmem>>, vector<1x8x128xf32>
    %76 = vector.shape_cast %75 : vector<1x8x128xf32> to vector<8x128xf32>
    %77 = vector.shape_cast %73 : vector<8x128xf32> to vector<1x8x128xf32>
    tpu.vector_store %arg8[%74, %c0_40, %c0_41], %77 {strides = array<i32>} : memref<4x8x128xf32, #tpu.memory_space<vmem>>, vector<1x8x128xf32>,
    %c4_i32 = arith.constant 4 : i32
    %c0_42 = arith.constant 0 : index
    %c0_43 = arith.constant 0 : index
    %78 = vector.load %arg9[%c0_42, %c0_43] : memref<8x128xf32, #tpu.memory_space<vmem>>, vector<8x128xf32>
    tpu.vector_store %arg9[%c0_42, %c0_43], %69 {strides = array<i32>} : memref<8x128xf32, #tpu.memory_space<vmem>>, vector<8x128xf32>,
    %c0_44 = arith.constant 0 : index
    %c0_45 = arith.constant 0 : index
    %79 = vector.load %arg10[%c0_44, %c0_45] : memref<8x128xf32, #tpu.memory_space<vmem>>, vector<8x128xf32>
    tpu.vector_store %arg10[%c0_44, %c0_45], %73 {strides = array<i32>} : memref<8x128xf32, #tpu.memory_space<vmem>>, vector<8x128xf32>,
    return
  }
  func.func @transform_0(%arg0: i32, %arg1: i32) -> (i32, i32, i32) {
    %c0_i32 = arith.constant 0 : i32
    %c0_i32_0 = arith.constant 0 : i32
    return %arg1, %arg0, %c0_i32 : i32, i32, i32
  }
  func.func @transform_1(%arg0: i32, %arg1: i32) -> (i32, i32) {
    %c0_i32 = arith.constant 0 : i32
    %c0_i32_0 = arith.constant 0 : i32
    %c0_i32_1 = arith.constant 0 : i32
    return %c0_i32, %c0_i32_0 : i32, i32
  }
  func.func @transform_2(%arg0: i32, %arg1: i32) -> (i32, i32) {
    %c0_i32 = arith.constant 0 : i32
    %c0_i32_0 = arith.constant 0 : i32
    %c0_i32_1 = arith.constant 0 : i32
    return %c0_i32, %c0_i32_0 : i32, i32
  }
  func.func @transform_3(%arg0: i32, %arg1: i32) -> (i32, i32) {
    %c0_i32 = arith.constant 0 : i32
    %c0_i32_0 = arith.constant 0 : i32
    %c0_i32_1 = arith.constant 0 : i32
    return %c0_i32, %c0_i32_0 : i32, i32
  }
  func.func @transform_4(%arg0: i32, %arg1: i32) -> (i32, i32) {
    %c0_i32 = arith.constant 0 : i32
    %c0_i32_0 = arith.constant 0 : i32
    %c0_i32_1 = arith.constant 0 : i32
    return %c0_i32, %c0_i32_0 : i32, i32
  }
  func.func @transform_5(%arg0: i32, %arg1: i32) -> (i32, i32) {
    %c0_i32 = arith.constant 0 : i32
    %c0_i32_0 = arith.constant 0 : i32
    %c0_i32_1 = arith.constant 0 : i32
    return %c0_i32, %c0_i32_0 : i32, i32
  }
  func.func @transform_6(%arg0: i32, %arg1: i32) -> (i32, i32, i32) {
    %c0_i32 = arith.constant 0 : i32
    %c0_i32_0 = arith.constant 0 : i32
    return %arg1, %arg0, %c0_i32 : i32, i32, i32
  }
}

</mosaic_0001>

<bundles_post_ra>
// kernel: tpu_custom_call.1
= control target key start
LH: loop header
LB: loop body
LE: loop exit
PB: predicated region body
PF: predicated region fallthrough
CT: control target
= control target key end

     0   :  { %s1714_s0 = inlined_call_operand.hbm [shape: f32[8,8,128], index: 0, kind: input, shape index: {}]   ;;  %s1715_s1 = inlined_call_operand.hbm [shape: f32[128,128], index: 1, kind: input, shape index: {}]   ;;  %s1716_s2 = inlined_call_operand.vmem [shape: f32[1,128], index: 2, kind: input, shape index: {}]   ;;  %s1717_s3 = inlined_call_operand.hbm [shape: f32[128,128], index: 3, kind: input, shape index: {}]   ;;  %s1718_s4 = inlined_call_operand.hbm [shape: f32[128,128], index: 4, kind: input, shape index: {}]   ;;  %s1719_s5 = inlined_call_operand.vmem [shape: f32[1,128], index: 5, kind: input, shape index: {}]   ;;  %s1720_s6 = inlined_call_operand.hbm [shape: f32[8,8,128], index: 6, kind: output, shape index: {}]  }
   0x1   :  { %1724 = sst [smem:[#allocation18_spill]] %s1715_s1 }
   0x2   :  { %1725 = sst [smem:[#allocation19_spill]] %s1717_s3 }
   0x3   :  { %1726 = sst [smem:[#allocation20_spill]] %s1718_s4 }
   0x4   :  { %11 = vsyncpa [#allocation5], 0 }
   0x5   :  { %13 = vsyncpa [#allocation5 + $0x1], 0 }
   0x6   :  { %14 = vsyncpa [#allocation8], 0 }
   0x7   :  { %15 = vsyncpa [#allocation11], 0 }
   0x8   :  { %16 = vsyncpa [#allocation6], 0 }
   0x9   :  { %18 = vsyncpa [#allocation6 + $0x1], 0  ;;  %s1213_s21 = smov 0   ;;  %s1215_s22 = smov 0  }
   0xa   :  { %s1217_s23 = smov 0   ;;  %s1219_s24 = smov 0  }
   0xb   :  { %s1221_s25 = smov 0   ;;  %s1223_s26 = smov 0  }
   0xc LB: > { %s812_s27 = sadd.s32 4294967295, %s1168_s26   ;;  %s813_s28 = sadd.s32 4294967294, %s1168_s26   ;;  %s1168_s26 = sphi %s1223_s26, %s24_s26   ;;  %s1164_s25 = sphi %s1221_s25, %s1746_s25   ;;  %s1160_s24 = sphi %s1219_s24, %s1745_s24   ;;  %s1156_s23 = sphi %s1217_s23, %s1744_s23   ;;  %s1152_s22 = sphi %s1215_s22, %s1743_s22   ;;  %s1148_s21 = sphi %s1213_s21, %s1742_s21  }
   0xd   : > { %p58_p0 = scmp.ne.s32.totalorder %s1152_s22, %s1148_s21  ;;  %p1247_p1 = scmp.eq.s32.totalorder %s812_s27, 0 }
   0xe   : > { %p1251_p2 = scmp.eq.s32.totalorder %s812_s27, 1  ;;  %p195_p3 = scmp.eq.s32.totalorder %s813_s28, 1 }
   0xf   : > { %p1257_p4 = por %p1247_p1, %p58_p0  ;;  %p814_p5 = scmp.ge.s32.totalorder %s1168_s26, 1 }
  0x10   : > { %p1262_p6 = por %p195_p3, %p58_p0  ;;  %p202_p7 = scmp.lt.s32.totalorder %s1168_s26, 3 }
  0x11   : > { %s1731_s1 = sld [smem:[#allocation18_spill]]  ;;  %s1170_s13 = smov [#allocation7]  }
  0x12   : > { %p1270_p8 = pnand %p814_p5, %p202_p7  ;;  %s215_s14 = sshll.u32 %s1170_s13, 4  ;;  %s216_s14 = int_to_ptr.vmem [resolvable:$true] %s215_s14 }
  0x13   : > { %p818_p11 = scmp.ge.s32.totalorder %s1168_s26, 2  ;;  %s1734_s3 = sld [smem:[#allocation19_spill]] }
  0x14   : > { %p858_p9 = pneg %p1270_p8  ;;  %s1721_s19 = smov 128  }
  0x15   : > { %s1722_s20 = smov 8   ;;  %s1173_s27 = smov [#allocation9]  }
  0x16   : > { %p1278_p10 = pnand %p858_p9, %p1247_p1  ;;  %s232_s28 = sshll.u32 %s1173_s27, 4  ;;  %s233_s28 = int_to_ptr.vmem [resolvable:$true] %s232_s28 }
  0x17   : > { %s213_s11 = sshll.u32 %s1731_s1, 4  ;;  %s1735_s4 = sld [smem:[#allocation20_spill]]  ;;  %s214_s11 = int_to_ptr.hbm [resolvable:$true] %s213_s11 }
  0x18   : > { %861 = dma.hbm_to_vmem [thread:$0]  (!%p1278_p10), %s214_s11, 2048, %s216_s14, [#allocation8], %s1721_s19, %s1721_s19, %s1722_s20  }
  0x19   : > { %s230_s18 = sshll.u32 %s1734_s3, 4  ;;  %s1174_s16 = smov [#allocation10]   ;;  %s231_s18 = int_to_ptr.hbm [resolvable:$true] %s230_s18 }
  0x1a   : > { %864 = dma.hbm_to_vmem [thread:$0]  (!%p1278_p10), %s231_s18, 2048, %s233_s28, [#allocation8], %s1721_s19, %s1721_s19, %s1722_s20  }
  0x1b   : > { %s246_s17 = sshll.u32 %s1174_s16, 4  ;;  %s33_s11 = sadd.s32 1, %s1164_s25  ;;  %s247_s17 = int_to_ptr.vmem [resolvable:$true] %s246_s17 }
  0x1c   : > { %p34_p12 = scmp.ge.s32.totalorder %s33_s11, 2  ;;  %s45_s14 = sadd.s32 1, %s1156_s23 }
  0x1d   : > { %s244_s13 = sshll.u32 %s1735_s4, 4  ;;  %p52_p13 = scmp.ne.s32.totalorder %s1156_s23, %s1152_s22  ;;  %s245_s13 = int_to_ptr.hbm [resolvable:$true] %s244_s13 }
  0x1e   : > { %867 = dma.hbm_to_vmem [thread:$0]  (!%p1278_p10), %s245_s13, 2048, %s247_s17, [#allocation11], %s1721_s19, %s1721_s19, %s1722_s20  }
  0x1f   : > { %p53_p0 = scmp.eq.s32.totalorder %s1168_s26, 0  ;;  %s1748_s11 = smov (%p34_p12, %s33_s11), 0 }
  0x20   : > { %1736 = sst [smem:[#allocation17_spill]] %s1748_s11  ;;  %p1317_p5 = por %p1251_p2, %p52_p13 }
  0x21   : > { %p1311_p3 = por %p53_p0, %p52_p13  ;;  %s40_s27 = ssub.s32 %s1164_s25, %s1748_s11 }
  0x22   : > { %p879_p7 = scmp.lt.s32.totalorder %s1168_s26, 2  ;;  %p43_p9 = scmp.eq.s32.totalorder %s40_s27, 0 }
  0x23   : > { %s263_s28 = sand.u32 1, %s1156_s23   ;;  %s840_s13 = sshll.u32 %s1164_s25, 5 }
  0x24   : > { %s819_s9 = sshll.u32 %s263_s28, 5  ;;  %s273_s19 = scalar_lea.hbm %s1714_s0, %s840_s13 }
  0x25   : > { %s1326_s10 = scalar_select %p43_p9, %s1156_s23, %s45_s14  }
  0x26   : > { %s267_s20 = scalar_lea.vmem [#allocation4], %s819_s9  ;;  %s274_s30 = sshll.u32 %s273_s19, 4  ;;  %s275_s30 = int_to_ptr.hbm [resolvable:$true] %s274_s30 }
  0x27   : > { %s276_s1 = sshll.u32 %s267_s20, 4  ;;  %p869_p2 = pnand %p879_p7, %p1311_p3  ;;  %s277_s1 = int_to_ptr.vmem [resolvable:$true] %s276_s1 }
  0x28   : > { %s264_s3 = scalar_lea.sflag [#allocation5], %s263_s28  ;;  %s1739_s4 = smov 8  }
  0x29   : > { %s1740_s11 = smov 128   ;;  %288 = sbr.rel (%p1270_p8) target bundleno = 815 (0x32f), region = 44 }
  0x2a   : > { %871 = dma.hbm_to_vmem [thread:$0]  (!%p869_p2), %s275_s30, 512, %s277_s1, %s264_s3, %s1740_s11, %s1740_s11, %s1739_s4  }
  0x2b   : > { %s1340_s14 = sand.u32 (!%p1270_p8), 1, %s1152_s22  }
  0x2c   : > { %s823_s20 = sshll.u32 (!%p1270_p8), %s1340_s14, 5  ;;  %s291_s19 = scalar_lea.sflag (!%p1270_p8), [#allocation5], %s1340_s14 }
  0x2d   : > { %s1344_s27 = scalar_lea.vmem (!%p1270_p8), [#allocation4], %s823_s20 }
  0x2e   : > { %1131 = dma.done.wait (%p1257_p4), %s291_s19, 512  }
  0x2f   : > { %1133 = vsyncadd (%p1257_p4), %s291_s19, 4294966784 }
  0x30   : > { %1135 = dma.done.wait (%p1247_p1), [#allocation8], 4096  }
  0x31   : > { %1137 = vsyncadd (%p1247_p1), [#allocation8], 4294963200 }
  0x32   : > { %1139 = dma.done.wait (%p1247_p1), [#allocation11], 2048  }
  0x33   : > { %1141 = vsyncadd (%p1247_p1), [#allocation11], 4294965248  ;;  %s1358_s1 = scalar_lea.vmem [#allocation12], %s823_s20  ;;  %p828_p8 = scmp.ne.s32.totalorder %s1160_s24, 0 }
  0x35   : > { %344 = sbr.rel (%p828_p8) target bundleno = 61 (0x3d), region = 64 }
  0x3a   : > { %v1175_v0 = vmov 0.0  }
  0x3b   : > { %345 = vst [vmem:[#allocation2] sm:$0xff] %v1175_v0 }
  0x3c   : > { %346 = vst [vmem:[#allocation3] sm:$0xff] %v1175_v0 }
  0x3d PF: > { %v1361_v1 = vld [vmem:[#allocation7 + $0x78] sm:$0xff]  ;;  %v1363_v2 = vld [vmem:[#allocation7 + $0x70] sm:$0xff]  ;;  %v1366_v3 = vld [vmem:[#allocation7 + $0x68] sm:$0xff]  ;;  %s841_s12 = sshll.u32 %s1160_s24, 5  ;;  %s695_s9 = sshll.u32 %s1358_s1, 4  ;;  %s696_s9 = int_to_ptr.vmem [resolvable:$true] %s695_s9 }
  0x3e   : > { %426 = vmatpush.msra.mxu1 %v1361_v1  ;;  %v1369_v4 = vld [vmem:[#allocation7 + $0x60] sm:$0xff]  ;;  %v1372_v5 = vld [vmem:[#allocation10 + $0x78] sm:$0xff]  ;;  %v1377_v7 = vld [vmem:[#allocation10 + $0x70] sm:$0xff]  ;;  %s694_s28 = scalar_lea.hbm %s1720_s6, %s841_s12  ;;  %s682_s16 = scalar_lea.sflag [#allocation6], %s1340_s14 }
  0x3f   : > { %v1374_v6 = vld [vmem:[#allocation7 + $0x58] sm:$0xff]  ;;  %405 = vmatpush.msra.mxu0 %v1372_v5  ;;  %472 = vmatpush.msra.mxu3 %v1372_v5  ;;  %v1381_v8 = vld [vmem:[#allocation10 + $0x68] sm:$0xff]  ;;  %v1383_v9 = vld [vmem:[#allocation7 + $0x50] sm:$0xff]  ;;  %s697_s13 = sshll.u32 %s694_s28, 4  ;;  %s1098_s19 = scalar_lea.hbm %s1720_s6, 64  ;;  %s698_s13 = int_to_ptr.hbm [resolvable:$true] %s697_s13 }
  0x40   : > { %427 = vmatpush.msra.mxu1 %v1363_v2  ;;  %v1388_v10 = vld [vmem:[#allocation10 + $0x60] sm:$0xff]  ;;  %v1390_v11 = vld [vmem:[#allocation7 + $0x48] sm:$0xff]  ;;  %v1395_v12 = vld [vmem:[#allocation10 + $0x58] sm:$0xff]  ;;  %s1092_s17 = sshra.s32 %s698_s13, 4  ;;  %s1093_s17 = int_to_ptr.hbm [resolvable:$true] %s1092_s17 }
  0x41   : > { %406 = vmatpush.msra.mxu0 %v1377_v7  ;;  %473 = vmatpush.msra.mxu3 %v1377_v7  ;;  %v1397_v13 = vld [vmem:[#allocation9 + $0x78] sm:$0xff]  ;;  %v1399_v14 = vld [vmem:[#allocation9 + $0x70] sm:$0xff]  ;;  %v1401_v15 = vld [vmem:[#allocation7 + $0x40] sm:$0xff]  ;;  %s1094_s24 = scalar_lea.hbm %s1093_s17, 32  ;;  %p1099_p12 = scmp.lt.s32.totalorder %s1093_s17, %s1720_s6 }
  0x42   : > { %428 = vmatpush.msra.mxu1 %v1366_v3  ;;  %449 = vmatpush.msra.mxu2 %v1397_v13  ;;  %v1406_v16 = vld [vmem:[#allocation10 + $0x50] sm:$0xff]  ;;  %v1408_v17 = vld [vmem:[#allocation9 + $0x68] sm:$0xff]  ;;  %v1411_v18 = vld [vmem:[#allocation7 + $0x38] sm:$0xff]  ;;  %p1095_p1 = scmp.ne.s32.totalorder %s1093_s17, %s1094_s24  ;;  %p1100_p13 = scmp.lt.s32.totalorder %s1098_s19, %s1094_s24 }
  0x43   : > { %407 = vmatpush.msra.mxu0 %v1381_v8  ;;  %474 = vmatpush.msra.mxu3 %v1381_v8  ;;  %v1416_v19 = vld [vmem:[#allocation10 + $0x48] sm:$0xff]  ;;  %v1418_v20 = vld [vmem:[#allocation9 + $0x60] sm:$0xff]  ;;  %v1421_v21 = vld [vmem:[#allocation7 + $0x30] sm:$0xff] }
  0x44   : > { %429 = vmatpush.msra.mxu1 %v1369_v4  ;;  %450 = vmatpush.msra.mxu2 %v1399_v14  ;;  %v1426_v22 = vld [vmem:[#allocation10 + $0x40] sm:$0xff]  ;;  %v1428_v23 = vld [vmem:[#allocation9 + $0x58] sm:$0xff]  ;;  %v1431_v24 = vld [vmem:[#allocation7 + $0x28] sm:$0xff]  ;;  %p1096_p4 = pnand %p1095_p1, %p1317_p5  ;;  %p1101_p0 = por %p1100_p13, %p1099_p12 }
  0x45   : > { %408 = vmatpush.msra.mxu0 %v1388_v10  ;;  %475 = vmatpush.msra.mxu3 %v1388_v10  ;;  %v1436_v25 = vld [vmem:[#allocation10 + $0x38] sm:$0xff]  ;;  %v1438_v26 = vld [vmem:[#allocation9 + $0x50] sm:$0xff]  ;;  %v1441_v27 = vld [vmem:[#allocation7 + $0x20] sm:$0xff] }
  0x46   : > { %430 = vmatpush.msra.mxu1 %v1374_v6  ;;  %451 = vmatpush.msra.mxu2 %v1408_v17  ;;  %v1446_v28 = vld [vmem:[#allocation10 + $0x30] sm:$0xff]  ;;  %v1448_v29 = vld [vmem:[#allocation9 + $0x48] sm:$0xff]  ;;  %v1451_v30 = vld [vmem:[#allocation7 + $0x18] sm:$0xff]  ;;  %p1097_p10 = pneg %p1096_p4 }
  0x47   : > { %409 = vmatpush.msra.mxu0 %v1395_v12  ;;  %476 = vmatpush.msra.mxu3 %v1395_v12  ;;  %v1456_v31 = vld [vmem:[#allocation10 + $0x28] sm:$0xff]  ;;  %v1458_v32 = vld [vmem:[#allocation9 + $0x40] sm:$0xff]  ;;  %v1461_v33 = vld [vmem:[#allocation7 + $0x10] sm:$0xff] }
  0x48   : > { %431 = vmatpush.msra.mxu1 %v1383_v9  ;;  %452 = vmatpush.msra.mxu2 %v1418_v20  ;;  %v1466_v34 = vld [vmem:[#allocation10 + $0x20] sm:$0xff]  ;;  %v1468_v35 = vld [vmem:[#allocation9 + $0x38] sm:$0xff]  ;;  %v1471_v36 = vld [vmem:[#allocation7 + $0x8] sm:$0xff]  ;;  %p1102_p3 = pnand %p1101_p0, %p1097_p10 }
  0x49   : > { %410 = vmatpush.msra.mxu0 %v1406_v16  ;;  %477 = vmatpush.msra.mxu3 %v1406_v16  ;;  %v1476_v37 = vld [vmem:[#allocation10 + $0x18] sm:$0xff]  ;;  %v1478_v38 = vld [vmem:[#allocation9 + $0x30] sm:$0xff]  ;;  %v1481_v39 = vld [vmem:[#allocation7] sm:$0xff] }
  0x4a   : > { %432 = vmatpush.msra.mxu1 %v1390_v11  ;;  %453 = vmatpush.msra.mxu2 %v1428_v23  ;;  %v403_v40 = vld [vmem:[#allocation2] sm:$0xff]  ;;  %v1492_v42 = vld [vmem:[#allocation10 + $0x8] sm:$0xff]  ;;  %v1496_v43 = vld [vmem:[#allocation10] sm:$0xff] }
  0x4b   : > { %411 = vmatpush.msra.mxu0 %v1416_v19  ;;  %478 = vmatpush.msra.mxu3 %v1416_v19  ;;  %v1486_v41 = vld [vmem:[#allocation10 + $0x10] sm:$0xff]  ;;  %v1545_v44 = vld [vmem:[#allocation9 + $0x28] sm:$0xff]  ;;  %v1549_v45 = vld [vmem:[#allocation9 + $0x20] sm:$0xff] }
  0x4c   : > { %433 = vmatpush.msra.mxu1 %v1401_v15  ;;  %454 = vmatpush.msra.mxu2 %v1438_v26  ;;  %v404_v46 = vld [vmem:[#allocation3] sm:$0xff]  ;;  %v1556_v48 = vld [vmem:[#allocation9 + $0x10] sm:$0xff]  ;;  %v1559_v49 = vld [vmem:[#allocation9 + $0x8] sm:$0xff] }
  0x4d   : > { %412 = vmatpush.msra.mxu0 %v1426_v22  ;;  %479 = vmatpush.msra.mxu3 %v1426_v22  ;;  %v1553_v47 = vld [vmem:[#allocation9 + $0x18] sm:$0xff]  ;;  %v1564_v50 = vld [vmem:[#allocation9] sm:$0xff]  ;;  %v1605_v52 = vld [vmem:[%s1716_s2] ss:$0 sm:$0xff] }
  0x4e   : > { %434 = vmatpush.msra.mxu1 %v1411_v18  ;;  %455 = vmatpush.msra.mxu2 %v1448_v29  ;;  %v425_v51 = vld [vmem:[%s1344_s27] sm:$0xff]  ;;  %v829_v58 = vld [vmem:[%s1344_s27 + $0x8] sm:$0xff]  ;;  %v1645_v62 = vld [vmem:[%s1719_s5] ss:$0 sm:$0xff] }
  0x4f   : > { %413 = vmatpush.msra.mxu0 %v1436_v25  ;;  %480 = vmatpush.msra.mxu3 %v1436_v25 }
  0x50   : > { %435 = vmatpush.msra.mxu1 %v1421_v21  ;;  %456 = vmatpush.msra.mxu2 %v1458_v32 }
  0x51   : > { %414 = vmatpush.msra.mxu0 %v1446_v28  ;;  %481 = vmatpush.msra.mxu3 %v1446_v28 }
  0x52   : > { %436 = vmatpush.msra.mxu1 %v1431_v24  ;;  %457 = vmatpush.msra.mxu2 %v1468_v35 }
  0x53   : > { %415 = vmatpush.msra.mxu0 %v1456_v31  ;;  %482 = vmatpush.msra.mxu3 %v1456_v31 }
  0x54   : > { %437 = vmatpush.msra.mxu1 %v1441_v27  ;;  %458 = vmatpush.msra.mxu2 %v1478_v38 }
  0x55   : > { %416 = vmatpush.msra.mxu0 %v1466_v34  ;;  %483 = vmatpush.msra.mxu3 %v1466_v34 }
  0x56   : > { %438 = vmatpush.msra.mxu1 %v1451_v30  ;;  %459 = vmatpush.msra.mxu2 %v1545_v44 }
  0x57   : > { %417 = vmatpush.msra.mxu0 %v1476_v37  ;;  %484 = vmatpush.msra.mxu3 %v1476_v37 }
  0x58   : > { %439 = vmatpush.msra.mxu1 %v1461_v33  ;;  %460 = vmatpush.msra.mxu2 %v1549_v45 }
  0x59   : > { %418 = vmatpush.msra.mxu0 %v1486_v41  ;;  %485 = vmatpush.msra.mxu3 %v1486_v41 }
  0x5a   : > { %440 = vmatpush.msra.mxu1 %v1471_v36  ;;  %461 = vmatpush.msra.mxu2 %v1553_v47 }
  0x5b   : > { %419 = vmatpush.msra.mxu0 %v1492_v42  ;;  %486 = vmatpush.msra.mxu3 %v1492_v42 }
  0x5c   : > { %441 = vmatpush.msra.mxu1 %v1481_v39  ;;  %462 = vmatpush.msra.mxu2 %v1556_v48 }
  0x5d   : > { %442 = vmatmul.f32.vlgmr.msra.gmra.mxu1 %v403_v40  ;;  %420 = vmatpush.msra.mxu0 %v1496_v43 }
  0x5e   : > { %517 = vmatpush.msrb.mxu1 %v1397_v13  ;;  %487 = vmatpush.msra.mxu3 %v1496_v43 }
  0x5f   : > { %494 = vmatpush.msrb.mxu0 %v1361_v1  ;;  %463 = vmatpush.msra.mxu2 %v1559_v49 }
  0x60   : > { %518 = vmatpush.msrb.mxu1 %v1399_v14  ;;  %563 = vmatpush.msrb.mxu3 %v1361_v1 }
  0x61   : > { %495 = vmatpush.msrb.mxu0 %v1363_v2  ;;  %464 = vmatpush.msra.mxu2 %v1564_v50 }
  0x62   : > { %519 = vmatpush.msrb.mxu1 %v1408_v17  ;;  %564 = vmatpush.msrb.mxu3 %v1363_v2 }
  0x63   : > { %496 = vmatpush.msrb.mxu0 %v1366_v3  ;;  %541 = vmatpush.msrb.mxu2 %v1372_v5 }
  0x64   : > { %520 = vmatpush.msrb.mxu1 %v1418_v20  ;;  %565 = vmatpush.msrb.mxu3 %v1366_v3 }
  0x65   : > { %497 = vmatpush.msrb.mxu0 %v1369_v4  ;;  %542 = vmatpush.msrb.mxu2 %v1377_v7 }
  0x66   : > { %521 = vmatpush.msrb.mxu1 %v1428_v23  ;;  %566 = vmatpush.msrb.mxu3 %v1369_v4 }
  0x67   : > { %498 = vmatpush.msrb.mxu0 %v1374_v6  ;;  %543 = vmatpush.msrb.mxu2 %v1381_v8 }
  0x68   : > { %522 = vmatpush.msrb.mxu1 %v1438_v26  ;;  %567 = vmatpush.msrb.mxu3 %v1374_v6 }
  0x69   : > { %499 = vmatpush.msrb.mxu0 %v1383_v9  ;;  %544 = vmatpush.msrb.mxu2 %v1388_v10 }
  0x6a   : > { %523 = vmatpush.msrb.mxu1 %v1448_v29  ;;  %568 = vmatpush.msrb.mxu3 %v1383_v9 }
  0x6b   : > { %500 = vmatpush.msrb.mxu0 %v1390_v11  ;;  %545 = vmatpush.msrb.mxu2 %v1395_v12 }
  0x6c   : > { %524 = vmatpush.msrb.mxu1 %v1458_v32  ;;  %569 = vmatpush.msrb.mxu3 %v1390_v11 }
  0x6d   : > { %501 = vmatpush.msrb.mxu0 %v1401_v15  ;;  %546 = vmatpush.msrb.mxu2 %v1406_v16 }
  0x6e   : > { %525 = vmatpush.msrb.mxu1 %v1468_v35  ;;  %570 = vmatpush.msrb.mxu3 %v1401_v15 }
  0x6f   : > { %502 = vmatpush.msrb.mxu0 %v1411_v18  ;;  %547 = vmatpush.msrb.mxu2 %v1416_v19 }
  0x70   : > { %526 = vmatpush.msrb.mxu1 %v1478_v38  ;;  %571 = vmatpush.msrb.mxu3 %v1411_v18 }
  0x71   : > { %503 = vmatpush.msrb.mxu0 %v1421_v21  ;;  %548 = vmatpush.msrb.mxu2 %v1426_v22 }
  0x72   : > { %572 = vmatpush.msrb.mxu3 %v1421_v21  ;;  %527 = vmatpush.msrb.mxu1 %v1545_v44 }
  0x73   : > { %504 = vmatpush.msrb.mxu0 %v1431_v24  ;;  %549 = vmatpush.msrb.mxu2 %v1436_v25 }
  0x74   : > { %573 = vmatpush.msrb.mxu3 %v1431_v24  ;;  %528 = vmatpush.msrb.mxu1 %v1549_v45 }
  0x75   : > { %505 = vmatpush.msrb.mxu0 %v1441_v27  ;;  %550 = vmatpush.msrb.mxu2 %v1446_v28 }
  0x76   : > { %574 = vmatpush.msrb.mxu3 %v1441_v27  ;;  %421 = vmatmul.f32.vlgmr.msra.gmra.mxu0 %v404_v46 }
  0x77   : > { %506 = vmatpush.msrb.mxu0 %v1451_v30  ;;  %529 = vmatpush.msrb.mxu1 %v1553_v47 }
  0x78   : > { %575 = vmatpush.msrb.mxu3 %v1451_v30  ;;  %551 = vmatpush.msrb.mxu2 %v1456_v31 }
  0x79   : > { %507 = vmatpush.msrb.mxu0 %v1461_v33  ;;  %530 = vmatpush.msrb.mxu1 %v1556_v48 }
  0x7a   : > { %576 = vmatpush.msrb.mxu3 %v1461_v33  ;;  %552 = vmatpush.msrb.mxu2 %v1466_v34 }
  0x7b   : > { %508 = vmatpush.msrb.mxu0 %v1471_v36  ;;  %531 = vmatpush.msrb.mxu1 %v1559_v49 }
  0x7c   : > { %577 = vmatpush.msrb.mxu3 %v1471_v36  ;;  %553 = vmatpush.msrb.mxu2 %v1476_v37 }
  0x7d   : > { %509 = vmatpush.msrb.mxu0 %v1481_v39  ;;  %532 = vmatpush.msrb.mxu1 %v1564_v50 }
  0x7e   : > { %578 = vmatpush.msrb.mxu3 %v1481_v39  ;;  %554 = vmatpush.msrb.mxu2 %v1486_v41 }
  0x7f   : > { %586 = vmatpush.msra.mxu0 %v1397_v13  ;;  %610 = vmatpush.msra.mxu1 %v1372_v5 }
  0x80   : > { %555 = vmatpush.msrb.mxu2 %v1492_v42 }
  0x81   : > { %587 = vmatpush.msra.mxu0 %v1399_v14  ;;  %611 = vmatpush.msra.mxu1 %v1377_v7 }
  0x82   : > { %556 = vmatpush.msrb.mxu2 %v1496_v43 }
  0x83   : > { %588 = vmatpush.msra.mxu0 %v1408_v17  ;;  %612 = vmatpush.msra.mxu1 %v1381_v8  ;;  %v831_v8 = vld [vmem:[%s1344_s27 + $0x10] sm:$0xff] }
  0x85   : > { %589 = vmatpush.msra.mxu0 %v1418_v20  ;;  %613 = vmatpush.msra.mxu1 %v1388_v10 }
  0x87   : > { %590 = vmatpush.msra.mxu0 %v1428_v23  ;;  %614 = vmatpush.msra.mxu1 %v1395_v12 }
  0x89   : > { %591 = vmatpush.msra.mxu0 %v1438_v26  ;;  %615 = vmatpush.msra.mxu1 %v1406_v16 }
  0x8b   : > { %592 = vmatpush.msra.mxu0 %v1448_v29  ;;  %616 = vmatpush.msra.mxu1 %v1416_v19 }
  0x8d   : > { %593 = vmatpush.msra.mxu0 %v1458_v32  ;;  %617 = vmatpush.msra.mxu1 %v1426_v22 }
  0x8f   : > { %594 = vmatpush.msra.mxu0 %v1468_v35  ;;  %618 = vmatpush.msra.mxu1 %v1436_v25 }
  0x91   : > { %595 = vmatpush.msra.mxu0 %v1478_v38  ;;  %619 = vmatpush.msra.mxu1 %v1446_v28 }
  0x93   : > { %596 = vmatpush.msra.mxu0 %v1545_v44  ;;  %620 = vmatpush.msra.mxu1 %v1456_v31 }
  0x95   : > { %597 = vmatpush.msra.mxu0 %v1549_v45  ;;  %621 = vmatpush.msra.mxu1 %v1466_v34 }
  0x97   : > { %598 = vmatpush.msra.mxu0 %v1553_v47  ;;  %622 = vmatpush.msra.mxu1 %v1476_v37 }
  0x99   : > { %599 = vmatpush.msra.mxu0 %v1556_v48  ;;  %623 = vmatpush.msra.mxu1 %v1486_v41 }
  0x9b   : > { %600 = vmatpush.msra.mxu0 %v1559_v49  ;;  %624 = vmatpush.msra.mxu1 %v1492_v42 }
  0x9d   : > { %601 = vmatpush.msra.mxu0 %v1564_v50  ;;  %625 = vmatpush.msra.mxu1 %v1496_v43 }
  0xda   : > { %v443_v53 = vpop.f32.mrf.mxu1 }
  0xdb   : > { %v446_v54 = vadd.f32 %v443_v53, %v425_v51 }
  0xdd   : > { %v447_v55 = vadd.f32 %v1605_v52, %v446_v54 }
  0xdf   : > { %942 = vtanh.f32 %v447_v55 }
  0xe5   : > { %v943_v56 = vpop.eup %942 }
  0xe6   : > { %465 = vmatmul.f32.vlgmr.msra.gmra.mxu2 %v943_v56  ;;  %510 = vmatmul.f32.vlgmr.msrb.gmra.mxu0 %v943_v56 }
  0xe7   : > { %632 = vmatpush.msra.mxu2 %v1361_v1 }
  0xe9   : > { %633 = vmatpush.msra.mxu2 %v1363_v2 }
  0xeb   : > { %634 = vmatpush.msra.mxu2 %v1366_v3 }
  0xed   : > { %635 = vmatpush.msra.mxu2 %v1369_v4 }
  0xef   : > { %636 = vmatpush.msra.mxu2 %v1374_v6 }
  0xf1   : > { %637 = vmatpush.msra.mxu2 %v1383_v9 }
  0xf3   : > { %638 = vmatpush.msra.mxu2 %v1390_v11  ;;  %v422_v57 = vpop.f32.mrf.mxu0 }
  0xf5   : > { %639 = vmatpush.msra.mxu2 %v1401_v15 }
  0xf7   : > { %640 = vmatpush.msra.mxu2 %v1411_v18  ;;  %v833_v18 = vld [vmem:[%s1344_s27 + $0x18] sm:$0xff] }
  0xf9   : > { %641 = vmatpush.msra.mxu2 %v1421_v21 }
  0xfb   : > { %642 = vmatpush.msra.mxu2 %v1431_v24 }
  0xfd   : > { %643 = vmatpush.msra.mxu2 %v1441_v27 }
  0xff   : > { %644 = vmatpush.msra.mxu2 %v1451_v30 }
 0x101   : > { %645 = vmatpush.msra.mxu2 %v1461_v33 }
 0x103   : > { %646 = vmatpush.msra.mxu2 %v1471_v36 }
 0x105   : > { %647 = vmatpush.msra.mxu2 %v1481_v39 }
 0x163   : > { %v511_v59 = vpop.f32.mrf.mxu0 }
 0x164   : > { %v514_v60 = vadd.f32 %v829_v58, %v511_v59 }
 0x166   : > { %v515_v61 = vadd.f32 %v1605_v52, %v514_v60 }
 0x168   : > { %944 = vtanh.f32 %v515_v61 }
 0x169   : > { %v466_v63 = vpop.f32.mrf.mxu2 }
 0x16a   : > { %v467_v0 = vadd.f32 %v466_v63, %v422_v57 }
 0x16c   : > { %v469_v1 = vadd.f32 %v1645_v62, %v467_v0 }
 0x16e   : > { %v945_v2 = vpop.eup %944  ;;  %946 = vtanh.f32 %v469_v1 }
 0x16f   : > { %533 = vmatmul.f32.vlgmr.msrb.gmra.mxu1 %v945_v2 }
 0x174   : > { %v947_v3 = vpop.eup %946 }
 0x175   : > { %471 = vst [vmem:[%s1358_s1] sm:$0xff] %v947_v3  ;;  %488 = vmatmul.f32.vlgmr.msra.gmra.mxu3 %v947_v3 }
 0x176   : > { %655 = vmatpush.msra.mxu3 %v1397_v13 }
 0x178   : > { %656 = vmatpush.msra.mxu3 %v1399_v14 }
 0x17a   : > { %657 = vmatpush.msra.mxu3 %v1408_v17 }
 0x17c   : > { %658 = vmatpush.msra.mxu3 %v1418_v20 }
 0x17d   : > { %579 = vmatmul.f32.vlgmr.msrb.gmra.mxu3 %v945_v2 }
 0x17e   : > { %659 = vmatpush.msra.mxu3 %v1428_v23 }
 0x180   : > { %660 = vmatpush.msra.mxu3 %v1438_v26 }
 0x182   : > { %661 = vmatpush.msra.mxu3 %v1448_v29 }
 0x184   : > { %662 = vmatpush.msra.mxu3 %v1458_v32 }
 0x186   : > { %663 = vmatpush.msra.mxu3 %v1468_v35 }
 0x188   : > { %664 = vmatpush.msra.mxu3 %v1478_v38 }
 0x18a   : > { %665 = vmatpush.msra.mxu3 %v1545_v44 }
 0x18c   : > { %666 = vmatpush.msra.mxu3 %v1549_v45 }
 0x18e   : > { %667 = vmatpush.msra.mxu3 %v1553_v47 }
 0x190   : > { %668 = vmatpush.msra.mxu3 %v1556_v48 }
 0x192   : > { %669 = vmatpush.msra.mxu3 %v1559_v49 }
 0x194   : > { %670 = vmatpush.msra.mxu3 %v1564_v50 }
 0x1ec   : > { %v534_v4 = vpop.f32.mrf.mxu1 }
 0x1f8   : > { %v489_v5 = vpop.f32.mrf.mxu3 }
 0x1f9   : > { %v535_v6 = vadd.f32 %v534_v4, %v489_v5 }
 0x1fb   : > { %v537_v7 = vadd.f32 %v1645_v62, %v535_v6 }
 0x1fd   : > { %948 = vtanh.f32 %v537_v7 }
 0x200   : > { %v580_v9 = vpop.f32.mrf.mxu3 }
 0x201   : > { %v583_v10 = vadd.f32 %v831_v8, %v580_v9 }
 0x203   : > { %v949_v11 = vpop.eup %948  ;;  %v584_v12 = vadd.f32 %v1605_v52, %v583_v10 }
 0x204   : > { %830 = vst [vmem:[%s1358_s1 + $0x8] sm:$0xff] %v949_v11  ;;  %557 = vmatmul.f32.vlgmr.msrb.gmra.mxu2 %v949_v11 }
 0x205   : > { %950 = vtanh.f32 %v584_v12 }
 0x20b   : > { %v951_v13 = vpop.eup %950 }
 0x20c   : > { %602 = vmatmul.f32.vlgmr.msra.gmra.mxu0 %v951_v13  ;;  %648 = vmatmul.f32.vlgmr.msra.gmra.mxu2 %v951_v13 }
 0x287   : > { %v558_v14 = vpop.f32.mrf.mxu2 }
 0x289   : > { %v603_v15 = vpop.f32.mrf.mxu0 }
 0x28a   : > { %v604_v16 = vadd.f32 %v603_v15, %v558_v14 }
 0x28c   : > { %v606_v17 = vadd.f32 %v1645_v62, %v604_v16 }
 0x28e   : > { %952 = vtanh.f32 %v606_v17 }
 0x28f   : > { %v649_v19 = vpop.f32.mrf.mxu2 }
 0x290   : > { %v652_v20 = vadd.f32 %v833_v18, %v649_v19 }
 0x292   : > { %v653_v21 = vadd.f32 %v1605_v52, %v652_v20 }
 0x294   : > { %v953_v22 = vpop.eup %952  ;;  %954 = vtanh.f32 %v653_v21 }
 0x295   : > { %832 = vst [vmem:[%s1358_s1 + $0x10] sm:$0xff] %v953_v22  ;;  %626 = vmatmul.f32.vlgmr.msra.gmra.mxu1 %v953_v22 }
 0x29a   : > { %v955_v23 = vpop.eup %954 }
 0x29b   : > { %679 = vst [vmem:[#allocation2] sm:$0xff] %v955_v23  ;;  %671 = vmatmul.f32.vlgmr.msra.gmra.mxu3 %v955_v23 }
 0x312   : > { %v627_v24 = vpop.f32.mrf.mxu1 }
 0x31e   : > { %v672_v25 = vpop.f32.mrf.mxu3 }
 0x31f   : > { %v673_v26 = vadd.f32 %v672_v25, %v627_v24 }
 0x321   : > { %v675_v27 = vadd.f32 %v1645_v62, %v673_v26 }
 0x323   : > { %956 = vtanh.f32 %v675_v27 }
 0x329   : > { %v957_v28 = vpop.eup %956 }
 0x32a   : > { %834 = vst [vmem:[%s1358_s1 + $0x18] sm:$0xff] %v957_v28 }
 0x32b   : > { %680 = vst [vmem:[#allocation3] sm:$0xff] %v957_v28 }
 0x32c   : > { %1105 = shalt.err (!%p1102_p3)
}
 0x32d   : > { %s1176_s14 = smov 128   ;;  %s1177_s1 = smov 8  }
 0x32e   : > { %856 = dma.vmem_to_hbm [thread:$0]  (%p1317_p5), %s696_s9, 512, %s698_s13, %s682_s16, %s1176_s14, %s1176_s14, %s1177_s1  }
 0x32f PF: > { %s712_s4 = sand.u32 1, %s1148_s21   ;;  %p873_p7 = pnand %p818_p11, %p1262_p6 }
 0x330   : > { %s713_s29 = scalar_lea.sflag [#allocation6], %s712_s4 }
 0x331   : > { %p874_p9 = pneg %p873_p7 }
 0x333   : > { %1143 = dma.done.wait (%p874_p9), %s713_s29, 512  }
 0x334   : > { %1145 = vsyncadd (%p874_p9), %s713_s29, 4294966784  ;;  %s24_s26 = sadd.s32 1, %s1168_s26   ;;  %s1741_s15 = sld [smem:[#allocation17_spill]] }
 0x335   : > { %p21_p2 = scmp.ge.s32.totalorder %s24_s26, 4   ;;  %s1742_s21 = smov %s1152_s22 }
 0x336   : > { %s1743_s22 = smov %s1156_s23  ;;  %s1744_s23 = smov %s1326_s10 }
 0x337   : > { %s1745_s24 = smov %s1164_s25  ;;  %23 = sbr.rel (!%p21_p2) target bundleno = 12 (0xc), region = 111 }
 0x33a   : > { %s1746_s25 = smov %s1741_s15 }
 0x33c   :  { %719 = vsyncpa [#allocation5], 1 }
 0x33d   :  { %721 = vsyncpa [#allocation5 + $0x1], 1 }
 0x33e   :  { %722 = vsyncpa [#allocation8], 1 }
 0x33f   :  { %723 = vsyncpa [#allocation11], 1 }
 0x340   :  { %724 = vsyncpa [#allocation6], 1 }
 0x341   :  { %726 = vsyncpa [#allocation6 + $0x1], 1 }

</bundles_post_ra>
